<compile_context>
chip_gen: v6e
topology: v6e:2x2x1
jax: 0.10.0
libtpu: 0.0.40
codegen_flags: <defaults>
</compile_context>

<pallas_src>
import functools

import jax
import jax.numpy as jnp
from jax.experimental import pallas as pl
from jax.experimental.pallas import tpu as pltpu


def _round_up(n, m):
    return (n + m - 1) // m * m


def _zd_to_zy_kernel(x1_ref, x2_ref, w1t_ref, w1b_ref, b1_ref, w2_ref, b2_ref,
                     out_ref, *, split):
    mm_dt = w1t_ref.dtype

    # ---- fused layer 1:  h = [x1 @ W1a | x2 @ W1b] + [b1a | b1b], ReLU -----
    h = jnp.dot(x1_ref[...].astype(mm_dt), w1t_ref[...],
                preferred_element_type=jnp.float32)
    h = h + jnp.dot(x2_ref[...].astype(mm_dt), w1b_ref[...],
                    preferred_element_type=jnp.float32)
    h = jnp.maximum(h + b1_ref[...], 0.0)                  # f32 bias + ReLU (VPU)

    # ---- fused layer 2:  [h1 | h2] @ blockdiag(W2a, W2b) + [b2a | b2b] -----
    o = jnp.dot(h.astype(mm_dt), w2_ref[...], preferred_element_type=jnp.float32)
    o = jnp.maximum(o + b2_ref[...], 0.0)

    # lanes [0, split)        -> zy_mu (plus lane padding, sliced off later)
    # lanes [split, 2*split)  -> zy_sigma = exp(0.5 * s)   (f32 EUP)
    out_ref[:, :split] = o[:, :split].astype(out_ref.dtype)
    out_ref[:, split:] = jnp.exp(0.5 * o[:, split:]).astype(out_ref.dtype)


def zd_to_zy_forward(x_1, x_2, params, *, tile_b=2048, mm_dtype=jnp.bfloat16,
                     out_dtype=None):
    """params: dict with w1a,b1a,w2a,b2a,w1b,b1b,w2b,b2b (weights in (in,out))."""
    B, zd = x_1.shape
    hid = params["w1a"].shape[1]                 # 4 * zd
    f32 = jnp.float32
    out_dtype = mm_dtype if out_dtype is None else out_dtype

    # ---- block-diagonal weight packing (per-call here; offline in a real
    #      model).  W1 is split into the x_1 / x_2 halves so the activations
    #      can be passed to the kernel unconcatenated. ------------------------
    h_out = 2 * hid                              # fused hidden features
    h_pad = _round_up(h_out, 128)                # lane-dense hidden width
    split = _round_up(zd, 128)                   # per-branch output lane stride
    n_pad = 2 * split                            # lane-dense fused output width

    w1t = jnp.zeros((zd, h_pad), f32).at[:, :hid].set(params["w1a"])
    w1b = jnp.zeros((zd, h_pad), f32).at[:, hid:h_out].set(params["w1b"])
    b1 = jnp.zeros((1, h_pad), f32)
    b1 = b1.at[:, :hid].set(params["b1a"]).at[:, hid:h_out].set(params["b1b"])

    w2 = jnp.zeros((h_pad, n_pad), f32)
    w2 = w2.at[:hid, :zd].set(params["w2a"])
    w2 = w2.at[hid:h_out, split:split + zd].set(params["w2b"])
    b2 = jnp.zeros((1, n_pad), f32)
    b2 = b2.at[:, :zd].set(params["b2a"]).at[:, split:split + zd].set(params["b2b"])

    w1t = w1t.astype(mm_dtype)                   # MXU operands in mm_dtype,
    w1b = w1b.astype(mm_dtype)                   # accumulation stays f32
    w2 = w2.astype(mm_dtype)

    # ---- batch tiling: big tiles; >=2 grid steps when possible (v7x 2 TCs) --
    gran = 16                                    # bf16 sublane-packing granularity
    tile_b = _round_up(max(int(tile_b), gran), gran)
    tile_b = min(tile_b, _round_up(B, gran))     # shrink-to-B only for tiny batches
    if tile_b > gran and _round_up(B, tile_b) // tile_b < 2:
        tile_b = _round_up(pl.cdiv(_round_up(B, gran), 2), gran)
    b_pad = _round_up(B, tile_b)
    grid = (b_pad // tile_b,)

    if b_pad != B:                               # pad only when needed; rows sliced off
        x_1 = jnp.pad(x_1, ((0, b_pad - B), (0, 0)))
        x_2 = jnp.pad(x_2, ((0, b_pad - B), (0, 0)))

    # ---- VMEM budget / cost hints -------------------------------------------
    mm_isz = jnp.dtype(mm_dtype).itemsize
    out_isz = jnp.dtype(out_dtype).itemsize
    x_isz = jnp.dtype(x_1.dtype).itemsize
    weight_bytes = ((w1t.size + w1b.size + w2.size) * mm_isz
                    + (b1.size + b2.size) * 4)
    io_tile_bytes = 2 * (2 * tile_b * zd * x_isz + tile_b * n_pad * out_isz)  # dbl-buf
    scratch_bytes = 4 * tile_b * (h_pad + 2 * n_pad)                          # f32 temps
    footprint = 2 * weight_bytes + io_tile_bytes + scratch_bytes + (16 << 20)
    try:
        vmem_cap = pltpu.get_tpu_info().vmem_capacity_bytes
    except Exception:                            # fallback: assume v7x (64 MiB)
        vmem_cap = 64 << 20
    vmem_limit = int(min(footprint, 0.75 * vmem_cap))

    cost = pl.CostEstimate(
        flops=int(2 * b_pad * (2 * zd * h_pad + h_pad * n_pad)),
        transcendentals=int(b_pad * split),
        bytes_accessed=int(2 * b_pad * zd * x_isz + weight_bytes
                           + b_pad * n_pad * out_isz),
    )

    out = pl.pallas_call(
        functools.partial(_zd_to_zy_kernel, split=split),
        out_shape=jax.ShapeDtypeStruct((b_pad, n_pad), out_dtype),
        grid_spec=pltpu.PrefetchScalarGridSpec(
            num_scalar_prefetch=0,
            grid=grid,
            in_specs=[
                pl.BlockSpec((tile_b, zd), lambda i: (i, 0)),    # x_1 tile per step
                pl.BlockSpec((tile_b, zd), lambda i: (i, 0)),    # x_2 tile per step
                pl.BlockSpec((zd, h_pad), lambda i: (0, 0)),     # W1 (x_1 half): resident
                pl.BlockSpec((zd, h_pad), lambda i: (0, 0)),     # W1 (x_2 half): resident
                pl.BlockSpec((1, h_pad), lambda i: (0, 0)),      # b1: resident
                pl.BlockSpec((h_pad, n_pad), lambda i: (0, 0)),  # W2: resident
                pl.BlockSpec((1, n_pad), lambda i: (0, 0)),      # b2: resident
            ],
            out_specs=pl.BlockSpec((tile_b, n_pad), lambda i: (i, 0)),
        ),
        compiler_params=pltpu.CompilerParams(
            dimension_semantics=("parallel",),
            vmem_limit_bytes=vmem_limit,
        ),
        cost_estimate=cost,
    )(x_1, x_2, w1t, w1b, b1, w2, b2)

    # mu starts at lane 0; sigma starts at the 128-aligned lane `split`, so
    # neither slice forces a relayout of the slab.  Results stay in out_dtype
    # (bf16 by default) to avoid an extra f32 upcast pass over HBM.
    zy_mu = out[:B, :zd]
    zy_sigma = out[:B, split:split + zd]
    return zy_mu, zy_sigma


def init_params(key, zd_dim, dtype=jnp.float32):
    """Deterministic PyTorch-Linear-style init: U(-1/sqrt(fan_in), 1/sqrt(fan_in))."""
    hid = 4 * zd_dim
    ks = jax.random.split(key, 8)

    def lin(kw, kb, fan_in, fan_out):
        bound = 1.0 / jnp.sqrt(fan_in)
        w = jax.random.uniform(kw, (fan_in, fan_out), dtype, -bound, bound)
        b = jax.random.uniform(kb, (1, fan_out), dtype, -bound, bound)
        return w, b

    w1a, b1a = lin(ks[0], ks[1], zd_dim, hid)
    w2a, b2a = lin(ks[2], ks[3], hid, zd_dim)
    w1b, b1b = lin(ks[4], ks[5], zd_dim, hid)
    w2b, b2b = lin(ks[6], ks[7], hid, zd_dim)
    return dict(w1a=w1a, b1a=b1a, w2a=w2a, b2a=b2a,
                w1b=w1b, b1b=b1b, w2b=w2b, b2b=b2b)


def zd_to_zy_reference(x_1, x_2, p):
    """Pure-JAX reference for correctness check (HIGHEST precision matmuls)."""
    hp = jax.lax.Precision.HIGHEST
    h1 = jnp.maximum(jnp.dot(x_1, p["w1a"], precision=hp) + p["b1a"], 0.0)
    mu = jnp.maximum(jnp.dot(h1, p["w2a"], precision=hp) + p["b2a"], 0.0)
    h2 = jnp.maximum(jnp.dot(x_2, p["w1b"], precision=hp) + p["b1b"], 0.0)
    sg = jnp.exp(0.5 * jnp.maximum(jnp.dot(h2, p["w2b"], precision=hp) + p["b2b"], 0.0))
    return mu, sg


if __name__ == "__main__":
    B, zd_dim = 8, 32                      # small shapes: batch=8, zd_dim=32
    key = jax.random.PRNGKey(0)
    k_x1, k_x2, k_p = jax.random.split(key, 3)

    x_1 = jax.random.normal(k_x1, (B, zd_dim), jnp.float32)
    x_2 = jax.random.normal(k_x2, (B, zd_dim), jnp.float32)
    params = init_params(k_p, zd_dim)

    ref_mu, ref_sigma = zd_to_zy_reference(x_1, x_2, params)

    # f32 MXU path + f32 output: tight check against the f32 reference.
    mu32, sg32 = zd_to_zy_forward(x_1, x_2, params, mm_dtype=jnp.float32)
    jax.block_until_ready((mu32, sg32))
    assert jnp.allclose(mu32, ref_mu, atol=1e-5, rtol=1e-5)
    assert jnp.allclose(sg32, ref_sigma, atol=1e-5, rtol=1e-5)

    # bf16 MXU path + bf16 output (perf default): f32 accumulation, relaxed check.
    mu16, sg16 = zd_to_zy_forward(x_1, x_2, params, mm_dtype=jnp.bfloat16)
    jax.block_until_ready((mu16, sg16))
    assert jnp.allclose(mu16.astype(jnp.float32), ref_mu, atol=3e-2, rtol=3e-2)
    assert jnp.allclose(sg16.astype(jnp.float32), ref_sigma, atol=3e-2, rtol=3e-2)

    print("KERNEL_OK")
</pallas_src>

<mosaic_0001>
module attributes {stable_mosaic.version = 11 : i64} {
  func.func @_zd_to_zy_kernel(%arg0: i32, %arg1: memref<16x32xf32, #tpu.memory_space<vmem>>, %arg2: memref<16x32xf32, #tpu.memory_space<vmem>>, %arg3: memref<32x256xf32, #tpu.memory_space<vmem>>, %arg4: memref<32x256xf32, #tpu.memory_space<vmem>>, %arg5: memref<1x256xf32, #tpu.memory_space<vmem>>, %arg6: memref<256x256xf32, #tpu.memory_space<vmem>>, %arg7: memref<1x256xf32, #tpu.memory_space<vmem>>, %arg8: memref<16x256xf32, #tpu.memory_space<vmem>>) attributes {dimension_semantics = [#tpu.dimension_semantics<parallel>], iteration_bounds = array<i64: 1>, scalar_prefetch = 0 : i64, scratch_operands = 0 : i64, tpu.core_type = #tpu.core_type<tc>, window_params = [{transform_indices = @transform_0, window_bounds = array<i64: 16, 32>}, {transform_indices = @transform_1, window_bounds = array<i64: 16, 32>}, {pipeline_mode = #tpu.pipeline_mode<synchronous>, transform_indices = @transform_2, window_bounds = array<i64: 32, 256>}, {pipeline_mode = #tpu.pipeline_mode<synchronous>, transform_indices = @transform_3, window_bounds = array<i64: 32, 256>}, {pipeline_mode = #tpu.pipeline_mode<synchronous>, transform_indices = @transform_4, window_bounds = array<i64: 1, 256>}, {pipeline_mode = #tpu.pipeline_mode<synchronous>, transform_indices = @transform_5, window_bounds = array<i64: 256, 256>}, {pipeline_mode = #tpu.pipeline_mode<synchronous>, transform_indices = @transform_6, window_bounds = array<i64: 1, 256>}, {transform_indices = @transform_7, window_bounds = array<i64: 16, 256>}]} {
    %c0 = arith.constant 0 : index
    %c0_0 = arith.constant 0 : index
    %0 = vector.load %arg1[%c0, %c0_0] : memref<16x32xf32, #tpu.memory_space<vmem>>, vector<16x32xf32>
    %c0_1 = arith.constant 0 : index
    %c0_2 = arith.constant 0 : index
    %1 = vector.load %arg3[%c0_1, %c0_2] : memref<32x256xf32, #tpu.memory_space<vmem>>, vector<32x256xf32>
    %cst = arith.constant dense<0.000000e+00> : vector<16x256xf32>
    %2 = tpu.matmul %0, %1, %cst {dimension_numbers = #tpu.dot_dimension_numbers<[1], [0], [0], [1], [0, 0, 1, 1], [], []>} : vector<16x32xf32>, vector<32x256xf32>, vector<16x256xf32> -> vector<16x256xf32>
    %c0_3 = arith.constant 0 : index
    %c0_4 = arith.constant 0 : index
    %3 = vector.load %arg2[%c0_3, %c0_4] : memref<16x32xf32, #tpu.memory_space<vmem>>, vector<16x32xf32>
    %c0_5 = arith.constant 0 : index
    %c0_6 = arith.constant 0 : index
    %4 = vector.load %arg4[%c0_5, %c0_6] : memref<32x256xf32, #tpu.memory_space<vmem>>, vector<32x256xf32>
    %cst_7 = arith.constant dense<0.000000e+00> : vector<16x256xf32>
    %5 = tpu.matmul %3, %4, %cst_7 {dimension_numbers = #tpu.dot_dimension_numbers<[1], [0], [0], [1], [0, 0, 1, 1], [], []>} : vector<16x32xf32>, vector<32x256xf32>, vector<16x256xf32> -> vector<16x256xf32>
    %6 = arith.addf %2, %5 : vector<16x256xf32>
    %c0_8 = arith.constant 0 : index
    %c0_9 = arith.constant 0 : index
    %7 = vector.load %arg5[%c0_8, %c0_9] : memref<1x256xf32, #tpu.memory_space<vmem>>, vector<1x256xf32>
    %8 = vector.broadcast %7 : vector<1x256xf32> to vector<16x256xf32>
    %9 = arith.addf %6, %8 : vector<16x256xf32>
    %cst_10 = arith.constant 0.000000e+00 : f32
    %10 = vector.broadcast %cst_10 : f32 to vector<16x256xf32>
    %11 = arith.maximumf %9, %10 : vector<16x256xf32>
    %c0_11 = arith.constant 0 : index
    %c0_12 = arith.constant 0 : index
    %12 = vector.load %arg6[%c0_11, %c0_12] : memref<256x256xf32, #tpu.memory_space<vmem>>, vector<256x256xf32>
    %cst_13 = arith.constant dense<0.000000e+00> : vector<16x256xf32>
    %13 = tpu.matmul %11, %12, %cst_13 {dimension_numbers = #tpu.dot_dimension_numbers<[1], [0], [0], [1], [0, 0, 1, 1], [], []>} : vector<16x256xf32>, vector<256x256xf32>, vector<16x256xf32> -> vector<16x256xf32>
    %c0_14 = arith.constant 0 : index
    %c0_15 = arith.constant 0 : index
    %14 = vector.load %arg7[%c0_14, %c0_15] : memref<1x256xf32, #tpu.memory_space<vmem>>, vector<1x256xf32>
    %15 = vector.broadcast %14 : vector<1x256xf32> to vector<16x256xf32>
    %16 = arith.addf %13, %15 : vector<16x256xf32>
    %cst_16 = arith.constant 0.000000e+00 : f32
    %17 = vector.broadcast %cst_16 : f32 to vector<16x256xf32>
    %18 = arith.maximumf %16, %17 : vector<16x256xf32>
    %19 = vector.extract_strided_slice %18 {offsets = [0, 0], sizes = [16, 128], strides = [1, 1]} : vector<16x256xf32> to vector<16x128xf32>
    %c0_17 = arith.constant 0 : index
    %c0_18 = arith.constant 0 : index
    %20 = vector.load %arg8[%c0_17, %c0_18] : memref<16x256xf32, #tpu.memory_space<vmem>>, vector<16x128xf32>
    tpu.vector_store %arg8[%c0_17, %c0_18], %19 {strides = array<i32>} : memref<16x256xf32, #tpu.memory_space<vmem>>, vector<16x128xf32>,
    %21 = vector.extract_strided_slice %18 {offsets = [0, 128], sizes = [16, 128], strides = [1, 1]} : vector<16x256xf32> to vector<16x128xf32>
    %cst_19 = arith.constant 5.000000e-01 : f32
    %22 = vector.broadcast %cst_19 : f32 to vector<16x128xf32>
    %23 = arith.mulf %22, %21 : vector<16x128xf32>
    %24 = math.exp %23 : vector<16x128xf32>
    %c0_20 = arith.constant 0 : index
    %c128 = arith.constant 128 : index
    %25 = vector.load %arg8[%c0_20, %c128] : memref<16x256xf32, #tpu.memory_space<vmem>>, vector<16x128xf32>
    tpu.vector_store %arg8[%c0_20, %c128], %24 {strides = array<i32>} : memref<16x256xf32, #tpu.memory_space<vmem>>, vector<16x128xf32>,
    return
  }
  func.func @transform_0(%arg0: i32) -> (i32, i32) {
    %c0_i32 = arith.constant 0 : i32
    %c0_i32_0 = arith.constant 0 : i32
    return %arg0, %c0_i32 : i32, i32
  }
  func.func @transform_1(%arg0: i32) -> (i32, i32) {
    %c0_i32 = arith.constant 0 : i32
    %c0_i32_0 = arith.constant 0 : i32
    return %arg0, %c0_i32 : i32, i32
  }
  func.func @transform_2(%arg0: i32) -> (i32, i32) {
    %c0_i32 = arith.constant 0 : i32
    %c0_i32_0 = arith.constant 0 : i32
    %c0_i32_1 = arith.constant 0 : i32
    return %c0_i32, %c0_i32_0 : i32, i32
  }
  func.func @transform_3(%arg0: i32) -> (i32, i32) {
    %c0_i32 = arith.constant 0 : i32
    %c0_i32_0 = arith.constant 0 : i32
    %c0_i32_1 = arith.constant 0 : i32
    return %c0_i32, %c0_i32_0 : i32, i32
  }
  func.func @transform_4(%arg0: i32) -> (i32, i32) {
    %c0_i32 = arith.constant 0 : i32
    %c0_i32_0 = arith.constant 0 : i32
    %c0_i32_1 = arith.constant 0 : i32
    return %c0_i32, %c0_i32_0 : i32, i32
  }
  func.func @transform_5(%arg0: i32) -> (i32, i32) {
    %c0_i32 = arith.constant 0 : i32
    %c0_i32_0 = arith.constant 0 : i32
    %c0_i32_1 = arith.constant 0 : i32
    return %c0_i32, %c0_i32_0 : i32, i32
  }
  func.func @transform_6(%arg0: i32) -> (i32, i32) {
    %c0_i32 = arith.constant 0 : i32
    %c0_i32_0 = arith.constant 0 : i32
    %c0_i32_1 = arith.constant 0 : i32
    return %c0_i32, %c0_i32_0 : i32, i32
  }
  func.func @transform_7(%arg0: i32) -> (i32, i32) {
    %c0_i32 = arith.constant 0 : i32
    %c0_i32_0 = arith.constant 0 : i32
    return %arg0, %c0_i32 : i32, i32
  }
}

</mosaic_0001>

<bundles_post_ra>
// kernel: tpu_custom_call.1
= control target key start
LH: loop header
LB: loop body
LE: loop exit
PB: predicated region body
PF: predicated region fallthrough
CT: control target
= control target key end

     0   :  { %12 = vsyncpa [#allocation3], 0  ;;  %s726_s0 = inlined_call_operand.hbm [shape: f32[16,32], index: 0, kind: input, shape index: {}]   ;;  %s727_s1 = inlined_call_operand.hbm [shape: f32[16,32], index: 1, kind: input, shape index: {}]   ;;  %s728_s2 = inlined_call_operand.hbm [shape: f32[32,256], index: 2, kind: input, shape index: {}]   ;;  %s729_s3 = inlined_call_operand.hbm [shape: f32[32,256], index: 3, kind: input, shape index: {}]   ;;  %s730_s4 = inlined_call_operand.vmem [shape: f32[1,256], index: 4, kind: input, shape index: {}]   ;;  %s731_s5 = inlined_call_operand.hbm [shape: f32[256,256], index: 5, kind: input, shape index: {}]   ;;  %s732_s6 = inlined_call_operand.vmem [shape: f32[1,256], index: 6, kind: input, shape index: {}]   ;;  %s733_s7 = inlined_call_operand.hbm [shape: f32[16,256], index: 7, kind: output, shape index: {}]  }
   0x1   :  { %13 = vsyncpa [#allocation6], 0 }
   0x2   :  { %14 = vsyncpa [#allocation9], 0 }
   0x3   :  { %15 = vsyncpa [#allocation4], 0  ;;  %s635_s24 = smov [#allocation5]  }
   0x4   :  { %s33_s25 = sshll.u32 %s635_s24, 4  ;;  %s34_s25 = int_to_ptr.vmem [resolvable:$true] %s33_s25 }
   0x5   :  { %s515_s26 = scalar_lea.vmem %s34_s25, 256  ;;  %p520_p1 = scmp.lt.s32.totalorder %s34_s25, %s34_s25 }
   0x6   :  { %p516_p0 = scmp.ne.s32.totalorder %s34_s25, %s515_s26  ;;  %p521_p2 = scmp.lt.s32.totalorder %s515_s26, %s515_s26 }
   0x8   :  { %p522_p3 = por %p521_p2, %p520_p1 }
   0xa   :  { %p523_p4 = pnand %p522_p3, %p516_p0 }
   0xc   :  { %526 = shalt.err (!%p523_p4)
}
   0xd   :  { %s636_s27 = smov 128   ;;  %s637_s28 = smov 8  }
   0xe   :  { %39 = dma.hbm_to_vmem [thread:$0]  %s727_s1, 256, %s34_s25, [#allocation6], %s636_s27, %s636_s27, %s637_s28  }
   0xf   :  { %s638_s8 = smov [#allocation8]   ;;  %s639_s10 = smov [#allocation2]  }
  0x10   :  { %s57_s9 = sshll.u32 %s638_s8, 4  ;;  %s21_s11 = sshll.u32 %s639_s10, 4  ;;  %s58_s9 = int_to_ptr.vmem [resolvable:$true] %s57_s9  ;;  %s22_s11 = int_to_ptr.vmem [resolvable:$true] %s21_s11 }
  0x11   :  { %s535_s12 = scalar_lea.vmem %s58_s9, 1024  ;;  %p540_p6 = scmp.lt.s32.totalorder %s58_s9, %s58_s9 }
  0x12   :  { %p536_p5 = scmp.ne.s32.totalorder %s58_s9, %s535_s12  ;;  %p541_p7 = scmp.lt.s32.totalorder %s535_s12, %s535_s12 }
  0x14   :  { %p542_p8 = por %p541_p7, %p540_p6 }
  0x16   :  { %p543_p9 = pnand %p542_p8, %p536_p5 }
  0x18   :  { %546 = shalt.err (!%p543_p9)
}
  0x19   :  { %s640_s13 = smov 256   ;;  %s641_s14 = smov 16  }
  0x1a   :  { %63 = dma.hbm_to_vmem [thread:$0]  %s729_s3, 1024, %s58_s9, [#allocation9], %s640_s13, %s640_s13, %s641_s14  }
  0x1b   :  { %s555_s1 = scalar_lea.vmem %s22_s11, 256  ;;  %p560_p11 = scmp.lt.s32.totalorder %s22_s11, %s22_s11 }
  0x1c   :  { %p556_p10 = scmp.ne.s32.totalorder %s22_s11, %s555_s1  ;;  %p561_p12 = scmp.lt.s32.totalorder %s555_s1, %s555_s1 }
  0x1e   :  { %p562_p13 = por %p561_p12, %p560_p11 }
  0x20   :  { %p563_p0 = pnand %p562_p13, %p556_p10 }
  0x22   :  { %566 = shalt.err (!%p563_p0)
}
  0x23   :  { %27 = dma.hbm_to_vmem [thread:$0]  %s726_s0, 256, %s22_s11, [#allocation3], %s636_s27, %s636_s27, %s637_s28  }
  0x24   :  { %s642_s19 = smov [#allocation7]   ;;  %s643_s21 = smov [#allocation10]  }
  0x25   :  { %s45_s20 = sshll.u32 %s642_s19, 4  ;;  %s71_s22 = sshll.u32 %s643_s21, 4  ;;  %s46_s20 = int_to_ptr.vmem [resolvable:$true] %s45_s20  ;;  %s72_s22 = int_to_ptr.vmem [resolvable:$true] %s71_s22 }
  0x26   :  { %s575_s23 = scalar_lea.vmem %s46_s20, 1024  ;;  %p580_p2 = scmp.lt.s32.totalorder %s46_s20, %s46_s20 }
  0x27   :  { %p576_p1 = scmp.ne.s32.totalorder %s46_s20, %s575_s23  ;;  %p581_p3 = scmp.lt.s32.totalorder %s575_s23, %s575_s23 }
  0x29   :  { %p582_p4 = por %p581_p3, %p580_p2 }
  0x2b   :  { %p583_p5 = pnand %p582_p4, %p576_p1 }
  0x2d   :  { %586 = shalt.err (!%p583_p5)
}
  0x2e   :  { %51 = dma.hbm_to_vmem [thread:$0]  %s728_s2, 1024, %s46_s20, [#allocation6], %s640_s13, %s640_s13, %s641_s14  }
  0x2f   :  { %s595_s0 = scalar_lea.vmem %s72_s22, 8192  ;;  %p600_p7 = scmp.lt.s32.totalorder %s72_s22, %s72_s22 }
  0x30   :  { %p596_p6 = scmp.ne.s32.totalorder %s72_s22, %s595_s0  ;;  %p601_p8 = scmp.lt.s32.totalorder %s595_s0, %s595_s0 }
  0x32   :  { %p602_p9 = por %p601_p8, %p600_p7 }
  0x34   :  { %p603_p10 = pnand %p602_p9, %p596_p6 }
  0x36   :  { %606 = shalt.err (!%p603_p10)
}
  0x37   :  { %77 = dma.hbm_to_vmem [thread:$0]  %s731_s5, 8192, %s72_s22, [#allocation9], %s640_s13, %s640_s13, %s641_s14  }
  0x38   :  { %627 = dma.done.wait [#allocation3], 256  }
  0x39   :  { %628 = vsyncadd [#allocation3], 4294967040 }
  0x3a   :  { %629 = dma.done.wait [#allocation6], 1280  }
  0x3b   :  { %630 = vsyncadd [#allocation6], 4294966016 }
  0x3c   :  { %631 = dma.done.wait [#allocation9], 9216  }
  0x3d   :  { %632 = vsyncadd [#allocation9], 4294958080  ;;  %v644_v0 = vmov 0.0   ;;  %v114_v1 = vld [vmem:[#allocation8 + $0x38] sm:$0xff]  ;;  %v113_v2 = vld [vmem:[#allocation8 + $0x30] sm:$0xff]  ;;  %vm115_vm0 = vcmask 261120  }
  0x3e   :  { %186 = vmatprep.mubr.f32.mxu1 %v644_v0  ;;  %v112_v3 = vld [vmem:[#allocation8 + $0x28] sm:$0xff]  ;;  %146 = vmatprep.subr.mxu1 %v114_v1  ;;  %v111_v4 = vld [vmem:[#allocation8 + $0x20] sm:$0xff]  ;;  %v110_v5 = vld [vmem:[#allocation8 + $0x18] sm:$0xff] }
  0x3f   :  { %147 = vmatpush1.msra.mxu1 %v113_v2  ;;  %v109_v6 = vld [vmem:[#allocation8 + $0x10] sm:$0xff]  ;;  %v108_v7 = vld [vmem:[#allocation8 + $0x8] sm:$0xff]  ;;  %v107_v8 = vld [vmem:[#allocation8] sm:$0xff] }
  0x40   :  { %148 = vmatprep.subr.mxu1 %v112_v3  ;;  %v105_v9 = vld [vmem:[#allocation5] sm:$0xff]  ;;  %v104_v10 = vld [vmem:[#allocation7 + $0x38] sm:$0xff]  ;;  %v102_v14 = vld [vmem:[#allocation7 + $0x28] sm:$0xff] }
  0x41   :  { %149 = vmatpush1.msra.mxu1 %v111_v4  ;;  %v333_v11 = vld [vmem:[#allocation10 + $0xf8] sm:$0xff]  ;;  %v103_v12 = vld [vmem:[#allocation7 + $0x30] sm:$0xff]  ;;  %v331_v15 = vld [vmem:[#allocation10 + $0xe8] sm:$0xff] }
  0x42   :  { %150 = vmatprep.subr.mxu1 %v110_v5  ;;  %378 = vmatprep.subr.mxu0 %v333_v11  ;;  %v332_v13 = vld [vmem:[#allocation10 + $0xf0] sm:$0xff]  ;;  %v101_v16 = vld [vmem:[#allocation7 + $0x20] sm:$0xff]  ;;  %v106_v18 = vld [vmem:[#allocation5 + $0x8] sm:$0xff] }
  0x43   :  { %151 = vmatpush1.msra.mxu1 %v109_v6  ;;  %379 = vmatpush1.msra.mxu0 %v332_v13  ;;  %v330_v17 = vld [vmem:[#allocation10 + $0xe0] sm:$0xff]  ;;  %v100_v19 = vld [vmem:[#allocation7 + $0x18] sm:$0xff]  ;;  %v99_v20 = vld [vmem:[#allocation7 + $0x10] sm:$0xff] }
  0x44   :  { %152 = vmatprep.subr.mxu1 %v108_v7  ;;  %380 = vmatprep.subr.mxu0 %v331_v15  ;;  %v98_v21 = vld [vmem:[#allocation7 + $0x8] sm:$0xff]  ;;  %v329_v22 = vld [vmem:[#allocation10 + $0xd8] sm:$0xff]  ;;  %v97_v23 = vld [vmem:[#allocation7] sm:$0xff] }
  0x45   :  { %153 = vmatpush1.msra.mxu1 %v107_v8  ;;  %381 = vmatpush1.msra.mxu0 %v330_v17  ;;  %v328_v24 = vld [vmem:[#allocation10 + $0xd0] sm:$0xff]  ;;  %v95_v25 = vld [vmem:[#allocation2] sm:$0xff]  ;;  %v327_v26 = vld [vmem:[#allocation10 + $0xc8] sm:$0xff] }
  0x46   :  { %488 = vmatmul.mubr.msk.f32.vlgmr.msra.gmra.mxu1 %vm115_vm0, %v105_v9  ;;  %229 = vmatprep.subr.mxu1 %v104_v10  ;;  %v326_v27 = vld [vmem:[#allocation10 + $0xc0] sm:$0xff]  ;;  %v325_v28 = vld [vmem:[#allocation10 + $0xb8] sm:$0xff]  ;;  %v324_v29 = vld [vmem:[#allocation10 + $0xb0] sm:$0xff] }
  0x47   :  { %230 = vmatpush1.msra.mxu1 %v103_v12  ;;  %192 = vmatprep.mubr.f32.mxu1 %v644_v0  ;;  %v96_v30 = vld [vmem:[#allocation2 + $0x8] sm:$0xff]  ;;  %v322_v32 = vld [vmem:[#allocation10 + $0xa0] sm:$0xff]  ;;  %v321_v33 = vld [vmem:[#allocation10 + $0x98] sm:$0xff] }
  0x48   :  { %231 = vmatprep.subr.mxu1 %v102_v14  ;;  %382 = vmatprep.subr.mxu0 %v329_v22  ;;  %v323_v31 = vld [vmem:[#allocation10 + $0xa8] sm:$0xff]  ;;  %v320_v34 = vld [vmem:[#allocation10 + $0x90] sm:$0xff]  ;;  %v318_v36 = vld [vmem:[#allocation10 + $0x80] sm:$0xff] }
  0x49   :  { %232 = vmatpush1.msra.mxu1 %v101_v16  ;;  %383 = vmatpush1.msra.mxu0 %v328_v24  ;;  %v319_v35 = vld [vmem:[#allocation10 + $0x88] sm:$0xff]  ;;  %v317_v37 = vld [vmem:[#allocation10 + $0x78] sm:$0xff]  ;;  %v316_v38 = vld [vmem:[#allocation10 + $0x70] sm:$0xff] }
  0x4a   :  { %489 = vmatmul.mubr.msk.f32.gmra.mxu1 %vm115_vm0, %v106_v18  ;;  %233 = vmatprep.subr.mxu1 %v100_v19  ;;  %v315_v39 = vld [vmem:[#allocation10 + $0x68] sm:$0xff]  ;;  %v314_v40 = vld [vmem:[#allocation10 + $0x60] sm:$0xff]  ;;  %v313_v41 = vld [vmem:[#allocation10 + $0x58] sm:$0xff] }
  0x4b   :  { %234 = vmatpush1.msra.mxu1 %v99_v20  ;;  %269 = vmatprep.mubr.f32.mxu1 %v644_v0  ;;  %v312_v42 = vld [vmem:[#allocation10 + $0x50] sm:$0xff]  ;;  %v311_v43 = vld [vmem:[#allocation10 + $0x48] sm:$0xff]  ;;  %v310_v44 = vld [vmem:[#allocation10 + $0x40] sm:$0xff] }
  0x4c   :  { %235 = vmatprep.subr.mxu1 %v98_v21  ;;  %384 = vmatprep.subr.mxu0 %v327_v26  ;;  %v309_v45 = vld [vmem:[#allocation10 + $0x38] sm:$0xff]  ;;  %v308_v46 = vld [vmem:[#allocation10 + $0x30] sm:$0xff]  ;;  %v307_v47 = vld [vmem:[#allocation10 + $0x28] sm:$0xff]  ;;  %v284_v21 = vlaneseq }
  0x4d   :  { %236 = vmatpush1.msra.mxu1 %v97_v23  ;;  %385 = vmatpush1.msra.mxu0 %v326_v27  ;;  %v306_v48 = vld [vmem:[#allocation10 + $0x20] sm:$0xff]  ;;  %v305_v49 = vld [vmem:[#allocation10 + $0x18] sm:$0xff]  ;;  %v304_v50 = vld [vmem:[#allocation10 + $0x10] sm:$0xff] }
  0x4e   :  { %490 = vmatmul.mubr.msk.f32.vlgmr.msra.gmra.mxu1 %vm115_vm0, %v95_v25  ;;  %386 = vmatprep.subr.mxu0 %v325_v28  ;;  %v303_v51 = vld [vmem:[#allocation10 + $0x8] sm:$0xff]  ;;  %v302_v52 = vld [vmem:[#allocation10] sm:$0xff]  ;;  %v365_v53 = vld [vmem:[#allocation10 + $0x1f8] sm:$0xff]  ;;  %v285_v23 = vshrl.u32 %v284_v21, 7 }
  0x4f   :  { %275 = vmatprep.mubr.f32.mxu1 %v644_v0  ;;  %387 = vmatpush1.msra.mxu0 %v324_v29  ;;  %v364_v54 = vld [vmem:[#allocation10 + $0x1f0] sm:$0xff]  ;;  %v363_v55 = vld [vmem:[#allocation10 + $0x1e8] sm:$0xff]  ;;  %v362_v56 = vld [vmem:[#allocation10 + $0x1e0] sm:$0xff] }
  0x50   :  { %388 = vmatprep.subr.mxu0 %v323_v31  ;;  %v361_v57 = vld [vmem:[#allocation10 + $0x1d8] sm:$0xff]  ;;  %v360_v58 = vld [vmem:[#allocation10 + $0x1d0] sm:$0xff]  ;;  %v359_v59 = vld [vmem:[#allocation10 + $0x1c8] sm:$0xff]  ;;  %v286_v26 = vsub.s32 0, %v285_v23  ;;  %v290_v28 = vsub.s32 1, %v285_v23 }
  0x51   :  { %389 = vmatpush1.msra.mxu0 %v322_v32  ;;  %v358_v60 = vld [vmem:[#allocation10 + $0x1c0] sm:$0xff]  ;;  %v357_v61 = vld [vmem:[#allocation10 + $0x1b8] sm:$0xff]  ;;  %v356_v62 = vld [vmem:[#allocation10 + $0x1b0] sm:$0xff] }
  0x52   :  { %491 = vmatmul.mubr.msk.f32.gmra.mxu1 %vm115_vm0, %v96_v30  ;;  %390 = vmatprep.subr.mxu0 %v321_v33  ;;  %v355_v63 = vld [vmem:[#allocation10 + $0x1a8] sm:$0xff]  ;;  %v354_v0 = vld [vmem:[#allocation10 + $0x1a0] sm:$0xff]  ;;  %v353_v1 = vld [vmem:[#allocation10 + $0x198] sm:$0xff] }
  0x53   :  { %391 = vmatpush1.msra.mxu0 %v320_v34  ;;  %v352_v2 = vld [vmem:[#allocation10 + $0x190] sm:$0xff]  ;;  %v351_v3 = vld [vmem:[#allocation10 + $0x188] sm:$0xff]  ;;  %v350_v4 = vld [vmem:[#allocation10 + $0x180] sm:$0xff] }
  0x54   :  { %392 = vmatprep.subr.mxu0 %v319_v35  ;;  %v349_v5 = vld [vmem:[#allocation10 + $0x178] sm:$0xff]  ;;  %v348_v6 = vld [vmem:[#allocation10 + $0x170] sm:$0xff]  ;;  %v347_v7 = vld [vmem:[#allocation10 + $0x168] sm:$0xff] }
  0x55   :  { %393 = vmatpush1.msra.mxu0 %v318_v36  ;;  %v346_v8 = vld [vmem:[#allocation10 + $0x160] sm:$0xff]  ;;  %v345_v9 = vld [vmem:[#allocation10 + $0x158] sm:$0xff]  ;;  %v344_v10 = vld [vmem:[#allocation10 + $0x150] sm:$0xff] }
  0x56   :  { %394 = vmatprep.subr.mxu0 %v317_v37  ;;  %v343_v11 = vld [vmem:[#allocation10 + $0x148] sm:$0xff]  ;;  %v342_v12 = vld [vmem:[#allocation10 + $0x140] sm:$0xff]  ;;  %v341_v13 = vld [vmem:[#allocation10 + $0x138] sm:$0xff] }
  0x57   :  { %395 = vmatpush1.msra.mxu0 %v316_v38  ;;  %v340_v14 = vld [vmem:[#allocation10 + $0x130] sm:$0xff]  ;;  %v339_v15 = vld [vmem:[#allocation10 + $0x128] sm:$0xff]  ;;  %v338_v16 = vld [vmem:[#allocation10 + $0x120] sm:$0xff] }
  0x58   :  { %396 = vmatprep.subr.mxu0 %v315_v39  ;;  %v337_v17 = vld [vmem:[#allocation10 + $0x118] sm:$0xff]  ;;  %v336_v18 = vld [vmem:[#allocation10 + $0x110] sm:$0xff]  ;;  %v335_v19 = vld [vmem:[#allocation10 + $0x108] sm:$0xff] }
  0x59   :  { %397 = vmatpush1.msra.mxu0 %v314_v40  ;;  %v334_v20 = vld [vmem:[#allocation10 + $0x100] sm:$0xff] }
  0x5a   :  { %398 = vmatprep.subr.mxu0 %v313_v41  ;;  %v282_v27 = vld [vmem:[%s730_s4] sm:$0x3] }
  0x5b   :  { %399 = vmatpush1.msra.mxu0 %v312_v42  ;;  %v287_v31 = vrot.slane %v282_v27, %v286_v26  ;;  %v291_v33 = vrot.slane %v282_v27, %v290_v28 }
  0x5c   :  { %400 = vmatprep.subr.mxu0 %v311_v43 }
  0x5d   :  { %401 = vmatpush1.msra.mxu0 %v310_v44 }
  0x5e   :  { %402 = vmatprep.subr.mxu0 %v309_v45 }
  0x5f   :  { %403 = vmatpush1.msra.mxu0 %v308_v46 }
  0x60   :  { %404 = vmatprep.subr.mxu0 %v307_v47 }
  0x61   :  { %405 = vmatpush1.msra.mxu0 %v306_v48  ;;  %v366_v48 = vld [vmem:[%s732_s6] sm:$0x3]  ;;  %s645_s6 = smov [#allocation11]  }
  0x62   :  { %406 = vmatprep.subr.mxu0 %v305_v49  ;;  %v371_v49 = vrot.slane %v366_v48, %v286_v26  ;;  %s474_s28 = sshll.u32 %s645_s6, 4  ;;  %s475_s28 = int_to_ptr.vmem [resolvable:$true] %s474_s28 }
  0x63   :  { %407 = vmatpush1.msra.mxu0 %v304_v50  ;;  %v375_v50 = vrot.slane %v366_v48, %v290_v28  ;;  %s607_s29 = scalar_lea.vmem %s475_s28, 512  ;;  %p612_p12 = scmp.lt.s32.totalorder %s475_s28, %s475_s28 }
  0x64   :  { %408 = vmatprep.subr.mxu0 %v303_v51  ;;  %p608_p11 = scmp.ne.s32.totalorder %s475_s28, %s607_s29  ;;  %p613_p13 = scmp.lt.s32.totalorder %s607_s29, %s607_s29 }
  0x65   :  { %409 = vmatpush1.msra.mxu0 %v302_v52 }
  0x66   :  { %410 = vmatprep.subr.mxu0 %v365_v53  ;;  %p614_p0 = por %p613_p13, %p612_p12 }
  0x67   :  { %411 = vmatpush2.msra.mxu0 %v364_v54 }
  0x68   :  { %412 = vmatprep.subr.mxu0 %v363_v55  ;;  %p615_p1 = pnand %p614_p0, %p608_p11 }
  0x69   :  { %413 = vmatpush2.msra.mxu0 %v362_v56 }
  0x6a   :  { %414 = vmatprep.subr.mxu0 %v361_v57 }
  0x6b   :  { %415 = vmatpush2.msra.mxu0 %v360_v58 }
  0x6c   :  { %416 = vmatprep.subr.mxu0 %v359_v59 }
  0x6d   :  { %417 = vmatpush2.msra.mxu0 %v358_v60 }
  0x6e   :  { %418 = vmatprep.subr.mxu0 %v357_v61 }
  0x6f   :  { %419 = vmatpush2.msra.mxu0 %v356_v62 }
  0x70   :  { %420 = vmatprep.subr.mxu0 %v355_v63 }
  0x71   :  { %421 = vmatpush2.msra.mxu0 %v354_v0 }
  0x72   :  { %422 = vmatprep.subr.mxu0 %v353_v1 }
  0x73   :  { %423 = vmatpush2.msra.mxu0 %v352_v2 }
  0x74   :  { %424 = vmatprep.subr.mxu0 %v351_v3 }
  0x75   :  { %425 = vmatpush2.msra.mxu0 %v350_v4 }
  0x76   :  { %426 = vmatprep.subr.mxu0 %v349_v5 }
  0x77   :  { %427 = vmatpush2.msra.mxu0 %v348_v6 }
  0x78   :  { %428 = vmatprep.subr.mxu0 %v347_v7 }
  0x79   :  { %429 = vmatpush2.msra.mxu0 %v346_v8 }
  0x7a   :  { %430 = vmatprep.subr.mxu0 %v345_v9 }
  0x7b   :  { %431 = vmatpush2.msra.mxu0 %v344_v10 }
  0x7c   :  { %432 = vmatprep.subr.mxu0 %v343_v11 }
  0x7d   :  { %433 = vmatpush2.msra.mxu0 %v342_v12 }
  0x7e   :  { %434 = vmatprep.subr.mxu0 %v341_v13 }
  0x7f   :  { %435 = vmatpush2.msra.mxu0 %v340_v14 }
  0x80   :  { %436 = vmatprep.subr.mxu0 %v339_v15 }
  0x81   :  { %437 = vmatpush2.msra.mxu0 %v338_v16 }
  0x82   :  { %438 = vmatprep.subr.mxu0 %v337_v17 }
  0x83   :  { %439 = vmatpush2.msra.mxu0 %v336_v18 }
  0x84   :  { %440 = vmatprep.subr.mxu0 %v335_v19 }
  0x85   :  { %441 = vmatpush2.msra.mxu0 %v334_v20 }
 0x106   :  { %v188_v22 = vpop.f32.mrf.mxu1 }
 0x108   :  { %v190_v24 = vpop.f32.mrf.mxu1 }
 0x10a   :  { %v194_v25 = vpop.f32.mrf.mxu1 }
 0x10c   :  { %v196_v29 = vpop.f32.mrf.mxu1 }
 0x10e   :  { %v271_v30 = vpop.f32.mrf.mxu1 }
 0x10f   :  { %v272_v32 = vadd.f32 %v271_v30, %v188_v22 }
 0x110   :  { %v273_v34 = vpop.f32.mrf.mxu1 }
 0x111   :  { %v274_v35 = vadd.f32 %v273_v34, %v190_v24  ;;  %v294_v36 = vadd.f32 %v287_v31, %v272_v32 }
 0x112   :  { %v277_v37 = vpop.f32.mrf.mxu1 }
 0x113   :  { %v278_v38 = vadd.f32 %v277_v37, %v194_v25  ;;  %v295_v39 = vadd.f32 %v291_v33, %v274_v35  ;;  %v298_v43 = vmax.f32 %v294_v36, 0.0 }
 0x114   :  { %v279_v40 = vpop.f32.mrf.mxu1 }
 0x115   :  { %v280_v41 = vadd.f32 %v279_v40, %v196_v29  ;;  %v299_v42 = vmax.f32 %v295_v39, 0.0  ;;  %v296_v44 = vadd.f32 %v287_v31, %v278_v38 }
 0x117   :  { %v297_v45 = vadd.f32 %v291_v33, %v280_v41  ;;  %442 = vmatprep.mubr.f32.mxu0 %v299_v42  ;;  %v300_v47 = vmax.f32 %v296_v44, 0.0 }
 0x118   :  { %443 = vmatmul.mubr.f32.vlgmr.msra.gmra.mxu0 %v298_v43 }
 0x119   :  { %v301_v46 = vmax.f32 %v297_v45, 0.0 }
 0x11b   :  { %448 = vmatprep.mubr.f32.mxu0 %v301_v46 }
 0x11c   :  { %449 = vmatmul.mubr.f32.gmra.mxu0 %v300_v47 }
 0x1d8   :  { %v444_v51 = vpop.f32.mrf.mxu0 }
 0x1d9   :  { %v445_v52 = vadd.f32 %v444_v51, %v371_v49 }
 0x1da   :  { %v446_v53 = vpop.f32.mrf.mxu0 }
 0x1db   :  { %v455_v54 = vmax.f32 %v445_v52, 0.0  ;;  %v447_v55 = vadd.f32 %v446_v53, %v375_v50 }
 0x1dc   :  { %v450_v56 = vpop.f32.mrf.mxu0 }
 0x1dd   :  { %459 = vst [vmem:[#allocation11] sm:$0xff] %v455_v54  ;;  %v456_v57 = vmax.f32 %v447_v55, 0.0  ;;  %v451_v58 = vadd.f32 %v450_v56, %v371_v49 }
 0x1de   :  { %v452_v59 = vpop.f32.mrf.mxu0 }
 0x1df   :  { %v461_v60 = vmul.f32 0.5, %v456_v57  ;;  %v457_v61 = vmax.f32 %v451_v58, 0.0  ;;  %v453_v62 = vadd.f32 %v452_v59, %v375_v50 }
 0x1e1   :  { %v463_v63 = vmul.f32 1.442695, %v461_v60  ;;  %460 = vst [vmem:[#allocation11 + $0x10] sm:$0xff] %v457_v61  ;;  %v458_v0 = vmax.f32 %v453_v62, 0.0 }
 0x1e3   :  { %503 = vpow2.f32 %v463_v63  ;;  %v462_v1 = vmul.f32 0.5, %v458_v0 }
 0x1e5   :  { %v465_v2 = vmul.f32 1.442695, %v462_v1 }
 0x1e7   :  { %505 = vpow2.f32 %v465_v2 }
 0x1f0   :  { %v504_v3 = vpop.eup %503 }
 0x1f1   :  { %467 = vst [vmem:[#allocation11 + $0x8] sm:$0xff] %v504_v3 }
 0x1f4   :  { %v506_v4 = vpop.eup %505 }
 0x1f5   :  { %468 = vst [vmem:[#allocation11 + $0x18] sm:$0xff] %v506_v4 }
 0x1f6   :  { %618 = shalt.err (!%p615_p1)
}
 0x1f7   :  { %480 = dma.vmem_to_hbm [thread:$0]  %s475_s28, 512, %s733_s7, [#allocation4], %s640_s13, %s640_s13, %s641_s14  }
 0x1f8   :  { %633 = dma.done.wait [#allocation4], 512  }
 0x1f9   :  { %634 = vsyncadd [#allocation4], 4294966784 }
 0x1fa   :  { %484 = vsyncpa [#allocation3], 1 }
 0x1fb   :  { %485 = vsyncpa [#allocation6], 1 }
 0x1fc   :  { %486 = vsyncpa [#allocation9], 1 }
 0x1fd   :  { %487 = vsyncpa [#allocation4], 1 }

</bundles_post_ra>
